<compile_context>
chip_gen: v7x
topology: tpu7x:2x2x1
jax: 0.10.0
libtpu: 0.0.40
codegen_flags: <defaults>
</compile_context>

<pallas_src>
import functools

import jax
import jax.numpy as jnp
from jax.experimental import pallas as pl
from jax.experimental.pallas import tpu as pltpu

_LANES = 128
# ~4 MiB per input buffer per pipeline stage; 2 inputs x 2 buffers = 16 MiB.
_TILE_BYTE_BUDGET = 4 * 1024 * 1024
# Explicit scoped-VMEM limit with headroom (v5e default is 16 MiB, physical is >= 64 MiB
# on every supported chip).
_VMEM_LIMIT_BYTES = 32 * 1024 * 1024


def _pow(diff, exponent):
    """Element-wise power on the VPU (no EUP exp/log for integer exponents)."""
    if exponent == 2:
        return diff * diff
    if isinstance(exponent, int):
        return jax.lax.integer_pow(diff, exponent)
    # TODO(synk): float (non-integer-typed) exponents lower via exp/log on TPU and
    # return NaN for negative differences, matching jnp.power but not torch.pow for
    # integer-valued float exponents. Pass a Python int exponent to avoid this.
    return jnp.power(diff, exponent)


def _partial_loss_kernel(exponent, rows_in_last_block, needs_mask,
                         yp_ref, y_ref, out_ref):
    # Cast per-tile in VMEM (free VPU work) instead of materializing f32 copies in HBM.
    diff = yp_ref[...].astype(jnp.float32) - y_ref[...].astype(jnp.float32)
    powed = _pow(diff, exponent)

    # Common path: unmasked sublane reduce -> (1, 128) lane-vector partial.
    out_ref[...] = jnp.sum(powed, axis=0, keepdims=True).reshape(1, 1, _LANES)

    if needs_mask:
        # Only the final grid block can contain out-of-bounds (garbage) rows.
        # Overwrite its partial with a row-masked reduce; every other block pays
        # nothing, keeping the kernel HBM-bound on v7x.
        @pl.when(pl.program_id(0) == pl.num_programs(0) - 1)
        def _():
            row = jax.lax.broadcasted_iota(jnp.int32, powed.shape, 0)
            masked = jnp.where(row < rows_in_last_block, powed, jnp.float32(0.0))
            out_ref[...] = jnp.sum(masked, axis=0, keepdims=True).reshape(1, 1, _LANES)


def custom_loss(y_pred, y, exponent=2, max_tile_rows=None):
    """Pallas TPU equivalent of torch.mean(torch.pow(y_pred - y, exponent))."""
    assert y_pred.shape == y.shape, "y_pred and y must have the same shape"
    total_n = y_pred.size

    flat_p = jnp.ravel(y_pred)
    flat_y = jnp.ravel(y)

    rows = total_n // _LANES
    prefix_n = rows * _LANES

    # Lane tail (< 128 elements): reduced in plain JAX, no full-array pad copy.
    tail_sum = jnp.float32(0.0)
    if prefix_n < total_n:
        tail_d = (flat_p[prefix_n:].astype(jnp.float32)
                  - flat_y[prefix_n:].astype(jnp.float32))
        tail_sum = jnp.sum(_pow(tail_d, exponent))

    if rows == 0:
        # Entire input is smaller than one lane row; nothing for the kernel to do.
        return tail_sum / jnp.float32(total_n)

    slab_p = flat_p[:prefix_n].reshape(rows, _LANES)
    slab_y = flat_y[:prefix_n].reshape(rows, _LANES)

    itemsize = jnp.dtype(y_pred.dtype).itemsize
    if max_tile_rows is None:
        # Dtype-scaled tile: equal bytes-per-step for f32 / bf16 / fp16, rounded to the
        # sublane packing (8 rows f32, 16 rows bf16, ...).
        packing = 8 * max(1, 4 // itemsize)
        budget_rows = _TILE_BYTE_BUDGET // (itemsize * _LANES)
        max_tile_rows = max(packing, (budget_rows // packing) * packing)

    tile_rows = rows if rows <= max_tile_rows else max_tile_rows
    grid = pl.cdiv(rows, tile_rows)
    needs_mask = (grid * tile_rows) != rows
    rows_in_last_block = rows - (grid - 1) * tile_rows

    kernel = functools.partial(
        _partial_loss_kernel, exponent, rows_in_last_block, needs_mask)

    cost = pl.CostEstimate(
        flops=3 * prefix_n,
        transcendentals=0,
        bytes_accessed=2 * prefix_n * itemsize + grid * _LANES * 4,
    )

    partials = pl.pallas_call(
        kernel,
        out_shape=jax.ShapeDtypeStruct((grid, 1, _LANES), jnp.float32),
        grid_spec=pl.GridSpec(
            grid=(grid,),
            in_specs=[
                pl.BlockSpec((tile_rows, _LANES), lambda i: (i, 0)),
                pl.BlockSpec((tile_rows, _LANES), lambda i: (i, 0)),
            ],
            # Carry-free per-block lane-vector partials (lane-dense, unmasked stores).
            out_specs=pl.BlockSpec((1, 1, _LANES), lambda i: (i, 0, 0)),
        ),
        compiler_params=pltpu.CompilerParams(
            # No cross-iteration carry -> grid shards across TCs (v7x megacore).
            dimension_semantics=("parallel",),
            vmem_limit_bytes=_VMEM_LIMIT_BYTES,
        ),
        cost_estimate=cost,
    )(slab_p, slab_y)

    # Final (tiny) cross-block + cross-lane reduce and mean in plain JAX.
    return (jnp.sum(partials) + tail_sum) / jnp.float32(total_n)


if __name__ == "__main__":
    key = jax.random.PRNGKey(0)
    k1, k2 = jax.random.split(key)

    # 1) Typical NCHW-like loss input (128-aligned, single block, no mask/tail).
    y_pred = jax.random.normal(k1, (2, 4, 16, 16), dtype=jnp.float32)
    y = jax.random.normal(k2, (2, 4, 16, 16), dtype=jnp.float32)
    loss = jax.block_until_ready(custom_loss(y_pred, y, exponent=2))
    ref = jnp.mean((y_pred - y) ** 2)
    assert jnp.allclose(loss, ref, rtol=1e-5, atol=1e-6), (loss, ref)

    # 2) Tiny ragged input (< 128 elements -> pure JAX tail path), odd exponent.
    yp3 = jax.random.normal(k1, (3, 5, 7), dtype=jnp.float32)
    y3 = jax.random.normal(k2, (3, 5, 7), dtype=jnp.float32)
    loss3 = jax.block_until_ready(custom_loss(yp3, y3, exponent=3))
    ref3 = jnp.mean((yp3 - y3) ** 3)
    assert jnp.allclose(loss3, ref3, rtol=1e-5, atol=1e-6), (loss3, ref3)

    # 3) Ragged size: kernel prefix (11 rows) + 92-element JAX tail.
    yp4 = jax.random.normal(k1, (5, 300), dtype=jnp.float32)
    y4 = jax.random.normal(k2, (5, 300), dtype=jnp.float32)
    loss4 = jax.block_until_ready(custom_loss(yp4, y4, exponent=2))
    ref4 = jnp.mean((yp4 - y4) ** 2)
    assert jnp.allclose(loss4, ref4, rtol=1e-5, atol=1e-6), (loss4, ref4)

    # 4) Multi-block grid with a partial last block (exercises the pl.when mask path)
    #    by overriding the tile size: 2597 elems -> 20 rows, tile 8 -> grid 3, tail 37.
    yp5 = jax.random.normal(k1, (2597,), dtype=jnp.float32)
    y5 = jax.random.normal(k2, (2597,), dtype=jnp.float32)
    loss5 = jax.block_until_ready(custom_loss(yp5, y5, exponent=2, max_tile_rows=8))
    ref5 = jnp.mean((yp5 - y5) ** 2)
    assert jnp.allclose(loss5, ref5, rtol=1e-5, atol=1e-6), (loss5, ref5)

    # 5) bf16 inputs (dtype-scaled tile path, in-kernel f32 accumulation).
    yp6 = jax.random.normal(k1, (4, 8, 32), dtype=jnp.bfloat16)
    y6 = jax.random.normal(k2, (4, 8, 32), dtype=jnp.bfloat16)
    loss6 = jax.block_until_ready(custom_loss(yp6, y6, exponent=2))
    ref6 = jnp.mean((yp6.astype(jnp.float32) - y6.astype(jnp.float32)) ** 2)
    assert jnp.allclose(loss6, ref6, rtol=1e-3, atol=1e-4), (loss6, ref6)

    print("KERNEL_OK")
</pallas_src>

<mosaic_0001>
module attributes {stable_mosaic.version = 11 : i64} {
  func.func @_partial_loss_kernel(%arg0: i32, %arg1: memref<16x128xf32, #tpu.memory_space<vmem>>, %arg2: memref<16x128xf32, #tpu.memory_space<vmem>>, %arg3: memref<1x1x128xf32, #tpu.memory_space<vmem>>) attributes {dimension_semantics = [#tpu.dimension_semantics<parallel>], iteration_bounds = array<i64: 1>, scalar_prefetch = 0 : i64, scratch_operands = 0 : i64, tpu.core_type = #tpu.core_type<tc>, window_params = [{transform_indices = @transform_0, window_bounds = array<i64: 16, 128>}, {transform_indices = @transform_1, window_bounds = array<i64: 16, 128>}, {transform_indices = @transform_2, window_bounds = array<i64: 1, 1, 128>}]} {
    %c0 = arith.constant 0 : index
    %c0_0 = arith.constant 0 : index
    %0 = vector.load %arg1[%c0, %c0_0] : memref<16x128xf32, #tpu.memory_space<vmem>>, vector<16x128xf32>
    %c0_1 = arith.constant 0 : index
    %c0_2 = arith.constant 0 : index
    %1 = vector.load %arg2[%c0_1, %c0_2] : memref<16x128xf32, #tpu.memory_space<vmem>>, vector<16x128xf32>
    %2 = arith.subf %0, %1 : vector<16x128xf32>
    %3 = arith.mulf %2, %2 : vector<16x128xf32>
    %cst = arith.constant dense<0.000000e+00> : vector<128xf32>
    %4 = vector.multi_reduction <add>, %3, %cst [0] : vector<16x128xf32> to vector<128xf32>
    %5 = vector.shape_cast %4 : vector<128xf32> to vector<1x128xf32>
    %6 = vector.shape_cast %5 : vector<1x128xf32> to vector<1x1x128xf32>
    %c0_3 = arith.constant 0 : index
    %c0_4 = arith.constant 0 : index
    %c0_5 = arith.constant 0 : index
    %7 = vector.load %arg3[%c0_3, %c0_4, %c0_5] : memref<1x1x128xf32, #tpu.memory_space<vmem>>, vector<1x1x128xf32>
    tpu.vector_store %arg3[%c0_3, %c0_4, %c0_5], %6 {strides = array<i32>} : memref<1x1x128xf32, #tpu.memory_space<vmem>>, vector<1x1x128xf32>,
    return
  }
  func.func @transform_0(%arg0: i32) -> (i32, i32) {
    %c0_i32 = arith.constant 0 : i32
    %c0_i32_0 = arith.constant 0 : i32
    return %arg0, %c0_i32 : i32, i32
  }
  func.func @transform_1(%arg0: i32) -> (i32, i32) {
    %c0_i32 = arith.constant 0 : i32
    %c0_i32_0 = arith.constant 0 : i32
    return %arg0, %c0_i32 : i32, i32
  }
  func.func @transform_2(%arg0: i32) -> (i32, i32, i32) {
    %c0_i32 = arith.constant 0 : i32
    %c0_i32_0 = arith.constant 0 : i32
    %c0_i32_1 = arith.constant 0 : i32
    return %arg0, %c0_i32, %c0_i32_0 : i32, i32, i32
  }
}

</mosaic_0001>

<bundles_post_ra>
// kernel: tpu_custom_call.1
= control target key start
LH: loop header
LB: loop body
LE: loop exit
PB: predicated region body
PF: predicated region fallthrough
CT: control target
= control target key end

     0   :  { %7 = vsyncpa [#allocation3], 0  ;;  %s205_s0 = inlined_call_operand.hbm [shape: f32[16,128], index: 0, kind: input, shape index: {}]   ;;  %s206_s1 = inlined_call_operand.hbm [shape: f32[16,128], index: 1, kind: input, shape index: {}]   ;;  %s207_s2 = inlined_call_operand.hbm [shape: f32[1,1,128], index: 2, kind: output, shape index: {}]  }
   0x1   :  { %8 = vsyncpa [#allocation6], 0 }
   0x2   :  { %9 = vsyncpa [#allocation4], 0  ;;  %s149_s9 = smov [#allocation2]   ;;  %s77_s13 = scalar_lea.hbm %s205_s0, 256 }
   0x3   :  { %s15_s10 = sshll.u32 %s149_s9, 4  ;;  %p78_p0 = scmp.ne.s32.totalorder %s205_s0, %s77_s13  ;;  %s16_s10 = int_to_ptr.vmem [resolvable:$true] %s15_s10 }
   0x4   :  { %p81_p1 = scmp.lt.u32.totalorder %s77_s13, %s205_s0 }
   0x6   :  { %p83_p2 = pnand %p81_p1, %p78_p0 }
   0x8   :  { %86 = shalt.err (!%p83_p2)
}
   0x9   :  { %s87_s18 = scalar_lea.vmem %s16_s10, 256  ;;  %p92_p4 = scmp.lt.s32.totalorder %s16_s10, %s16_s10 }
   0xa   :  { %p88_p3 = scmp.ne.s32.totalorder %s16_s10, %s87_s18  ;;  %p93_p5 = scmp.lt.s32.totalorder %s87_s18, %s87_s18 }
   0xc   :  { %p94_p6 = por %p93_p5, %p92_p4 }
   0xe   :  { %p95_p7 = pnand %p94_p6, %p88_p3 }
  0x10   :  { %98 = shalt.err (!%p95_p7)
}
  0x11   :  { %s150_s19 = smov 128   ;;  %s151_s20 = smov 8  }
  0x12   :  { %21 = dma.hbm_to_vmem [thread:$0]  %s205_s0, 256, %s16_s10, [#allocation3], %s150_s19, %s150_s19, %s151_s20  }
  0x13   :  { %s152_s23 = smov [#allocation5]   ;;  %s99_s27 = scalar_lea.hbm %s206_s1, 256 }
  0x14   :  { %s27_s24 = sshll.u32 %s152_s23, 4  ;;  %p100_p8 = scmp.ne.s32.totalorder %s206_s1, %s99_s27  ;;  %s28_s24 = int_to_ptr.vmem [resolvable:$true] %s27_s24 }
  0x15   :  { %p103_p9 = scmp.lt.u32.totalorder %s99_s27, %s206_s1 }
  0x17   :  { %p105_p10 = pnand %p103_p9, %p100_p8 }
  0x19   :  { %108 = shalt.err (!%p105_p10)
}
  0x1a   :  { %s109_s4 = scalar_lea.vmem %s28_s24, 256  ;;  %p114_p12 = scmp.lt.s32.totalorder %s28_s24, %s28_s24 }
  0x1b   :  { %p110_p11 = scmp.ne.s32.totalorder %s28_s24, %s109_s4  ;;  %p115_p13 = scmp.lt.s32.totalorder %s109_s4, %s109_s4 }
  0x1d   :  { %p116_p0 = por %p115_p13, %p114_p12 }
  0x1f   :  { %p117_p1 = pnand %p116_p0, %p110_p11 }
  0x21   :  { %120 = shalt.err (!%p117_p1)
}
  0x22   :  { %33 = dma.hbm_to_vmem [thread:$0]  %s206_s1, 256, %s28_s24, [#allocation6], %s150_s19, %s150_s19, %s151_s20  }
  0x23   :  { %143 = dma.done.wait [#allocation3], 256  }
  0x24   :  { %144 = vsyncadd [#allocation3], 4294967040 }
  0x25   :  { %145 = dma.done.wait [#allocation6], 256  }
  0x26   :  { %146 = vsyncadd [#allocation6], 4294967040  ;;  %v40_v0 = vld [vmem:[#allocation2] sm:$0xff]  ;;  %v41_v1 = vld [vmem:[#allocation2 + $0x8] sm:$0xff]  ;;  %s153_s6 = smov [#allocation7]  }
  0x27   :  { %v42_v2 = vld [vmem:[#allocation5] sm:$0xff]  ;;  %v43_v3 = vld [vmem:[#allocation5 + $0x8] sm:$0xff]  ;;  %s62_s7 = sshll.u32 %s153_s6, 4  ;;  %s63_s7 = int_to_ptr.vmem [resolvable:$true] %s62_s7 }
  0x28   :  { %v44_v4 = vsub.f32 %v40_v0, %v42_v2  ;;  %v45_v5 = vsub.f32 %v41_v1, %v43_v3  ;;  %s121_s1 = scalar_lea.vmem %s63_s7, 16  ;;  %s125_s8 = scalar_lea.vmem %s63_s7, 32 }
  0x29   :  { %p122_p2 = scmp.ne.s32.totalorder %s63_s7, %s121_s1  ;;  %p126_p3 = scmp.lt.s32.totalorder %s63_s7, %s63_s7 }
  0x2a   :  { %v46_v6 = vmul.f32 %v44_v4, %v44_v4  ;;  %v47_v7 = vmul.f32 %v45_v5, %v45_v5  ;;  %p127_p4 = scmp.lt.s32.totalorder %s125_s8, %s121_s1 }
  0x2c   :  { %v48_v8 = vadd.f32 %v47_v7, %v46_v6  ;;  %p128_p5 = por %p127_p4, %p126_p3 }
  0x2e   :  { %v49_v9 = vrot.slane %v48_v8, 4  ;;  %p129_p6 = pnand %p128_p5, %p122_p2 }
  0x30   :  { %v50_v10 = vadd.f32 %v49_v9, %v48_v8 }
  0x32   :  { %v51_v11 = vrot.slane %v50_v10, 2 }
  0x34   :  { %v52_v12 = vadd.f32 %v51_v11, %v50_v10 }
  0x36   :  { %v53_v13 = vrot.slane %v52_v12, 1 }
  0x38   :  { %v54_v14 = vadd.f32 %v53_v13, %v52_v12 }
  0x3a   :  { %55 = vst [vmem:[#allocation7] sm:$0x1] %v54_v14 }
  0x3b   :  { %132 = shalt.err (!%p129_p6)
}
  0x3c   :  { %s133_s11 = scalar_lea.hbm %s207_s2, 16 }
  0x3d   :  { %p134_p7 = scmp.ne.s32.totalorder %s207_s2, %s133_s11  ;;  %p137_p8 = scmp.lt.u32.totalorder %s133_s11, %s207_s2 }
  0x3f   :  { %p139_p9 = pnand %p137_p8, %p134_p7 }
  0x41   :  { %142 = shalt.err (!%p139_p9)
}
  0x42   :  { %65 = dma.vmem_to_hbm [thread:$0]  %s63_s7, 16, %s207_s2, [#allocation4]  }
  0x43   :  { %147 = dma.done.wait [#allocation4], 16  }
  0x44   :  { %148 = vsyncadd [#allocation4], 4294967280 }
  0x45   :  { %69 = vsyncpa [#allocation3], 1 }
  0x46   :  { %70 = vsyncpa [#allocation6], 1 }
  0x47   :  { %71 = vsyncpa [#allocation4], 1 }

</bundles_post_ra>
